<compile_context>
chip_gen: v7x
topology: tpu7x:2x2x1
jax: 0.10.0
libtpu: 0.0.40
codegen_flags: <defaults>
</compile_context>

<pallas_src>
import functools

import jax
import jax.numpy as jnp
import numpy as np
from jax.experimental import pallas as pl
from jax.experimental.pallas import tpu as pltpu

_EPS = 1e-6  # F.pairwise_distance default eps (added to the difference).


# ---------------------------------------------------------------------------
# Pallas kernel: fused in-VMEM row gather + contrastive reduction (one step)
# ---------------------------------------------------------------------------
def _sampler_loss_kernel(emb_ref, pos_idx_ref, neg_idx_ref, o_ref,
                         *, margin, num_pairs):
    n_rows, dim = emb_ref.shape
    emb = emb_ref[...].astype(jnp.float32)                        # (N, D)

    # In-VMEM row gather as a one-hot matmul on the MXU.  HIGHEST precision
    # keeps the f32 gather exact (one-hot entries are exact 0/1).
    col_ids = jax.lax.broadcasted_iota(jnp.int32, (num_pairs, n_rows), 1)
    pos_oh = (pos_idx_ref[...] == col_ids).astype(jnp.float32)    # (P, N)
    neg_oh = (neg_idx_ref[...] == col_ids).astype(jnp.float32)    # (P, N)
    p = jnp.dot(pos_oh, emb, preferred_element_type=jnp.float32,
                precision=jax.lax.Precision.HIGHEST)              # (P, D)
    n = jnp.dot(neg_oh, emb, preferred_element_type=jnp.float32,
                precision=jax.lax.Precision.HIGHEST)              # (P, D)
    a = emb[:num_pairs, :]                                        # anchors = rows 0..P-1

    # (P, D) -> (P, 1) squared-distance reductions pushed onto the MXU via a
    # ones-vector matmul, keeping the VPU purely elementwise and the XLU free.
    ones_col = jnp.ones((dim, 1), dtype=jnp.float32)

    # positive: pairwise_distance(a, p)^2 == sum((a - p + eps)^2)  (no sqrt).
    d_pos = a - p + _EPS
    pos_sq = jnp.dot(d_pos * d_pos, ones_col,
                     preferred_element_type=jnp.float32,
                     precision=jax.lax.Precision.HIGHEST)         # (P, 1)

    # negative: clamp(margin - ||a - n + eps||, min=0)^2
    d_neg = a - n + _EPS
    neg_sq = jnp.dot(d_neg * d_neg, ones_col,
                     preferred_element_type=jnp.float32,
                     precision=jax.lax.Precision.HIGHEST)         # (P, 1)
    hinge = jnp.maximum(jnp.float32(margin) - jnp.sqrt(neg_sq), 0.0)

    # loss = cat((pos_loss, neg_loss)).mean()  over 2 * num_pairs terms.
    per_pair = pos_sq + hinge * hinge                             # (P, 1)
    o_ref[...] = (jnp.sum(per_pair, axis=0, keepdims=True)
                  * jnp.float32(1.0 / (2.0 * num_pairs)))


def contrastive_loss_pallas(embeddings, pos_idx, neg_idx, margin=0.2):
    """embeddings: (N, D); pos_idx / neg_idx: (P,) int32 row indices.
    Anchors are implicitly rows 0..P-1 (identity gather elided)."""
    N, D = embeddings.shape
    P = int(pos_idx.shape[0])
    pos2d = pos_idx.reshape(P, 1).astype(jnp.int32)
    neg2d = neg_idx.reshape(P, 1).astype(jnp.int32)

    kernel = functools.partial(_sampler_loss_kernel,
                               margin=float(margin), num_pairs=P)

    out = pl.pallas_call(
        kernel,
        out_shape=jax.ShapeDtypeStruct((1, 1), jnp.float32),
        grid=(1,),  # single step: the whole working set lives in VMEM
        in_specs=[
            pl.BlockSpec((N, D), lambda i: (0, 0)),   # full embedding table
            pl.BlockSpec((P, 1), lambda i: (0, 0)),   # positive indices
            pl.BlockSpec((P, 1), lambda i: (0, 0)),   # negative indices
        ],
        out_specs=pl.BlockSpec((1, 1), lambda i: (0, 0)),
        compiler_params=pltpu.CompilerParams(
            dimension_semantics=("arbitrary",),
        ),
    )(embeddings, pos2d, neg2d)
    return out[0, 0]


# ---------------------------------------------------------------------------
# On-device deterministic sampler (jnp mirror of the module's pdist mining)
# ---------------------------------------------------------------------------
def pdist_jnp(e, squared=False, eps=1e-12):
    """jnp mirror of the module's `pdist` helper."""
    e = e.astype(jnp.float32)
    e_sq = jnp.sum(e * e, axis=1)
    prod = e @ e.T
    res = jnp.maximum(e_sq[:, None] + e_sq[None, :] - 2.0 * prod, eps)
    if not squared:
        res = jnp.sqrt(res)
    n = e.shape[0]
    return jnp.where(jnp.eye(n, dtype=bool), 0.0, res)


def mine_triplets(embeddings, labels):
    """Deterministic stand-in for the injected `_Sampler`:
    anchor i = row i; positive = hardest (farthest) same-label row;
    negative = hardest (closest) different-label row, both via pdist."""
    n = embeddings.shape[0]
    dist = pdist_jnp(embeddings)
    same = (labels[:, None] == labels[None, :]) & ~jnp.eye(n, dtype=bool)
    diff = labels[:, None] != labels[None, :]
    arange = jnp.arange(n, dtype=jnp.int32)

    has_pos = jnp.any(same, axis=1)
    pos_idx = jnp.where(
        has_pos,
        jnp.argmax(jnp.where(same, dist, -jnp.inf), axis=1).astype(jnp.int32),
        arange)
    has_neg = jnp.any(diff, axis=1)
    neg_idx = jnp.where(
        has_neg,
        jnp.argmin(jnp.where(diff, dist, jnp.inf), axis=1).astype(jnp.int32),
        arange)
    return pos_idx, neg_idx


def sampler_forward(embeddings, labels, margin=0.2):
    """Full forward: on-device triplet mining (plain jnp) + Pallas loss."""
    # TODO(synk): the argmax/argmin mining stays in plain jnp (no Pallas
    # equivalent needed); only the gather + loss reduction runs in the kernel.
    pos_idx, neg_idx = mine_triplets(embeddings, labels)
    return contrastive_loss_pallas(embeddings, pos_idx, neg_idx, margin=margin)


# ---------------------------------------------------------------------------
# Pure-JAX reference
# ---------------------------------------------------------------------------
def _reference(embeddings, pos_idx, neg_idx, margin=0.2):
    a = embeddings.astype(jnp.float32)
    p = embeddings[pos_idx].astype(jnp.float32)
    n = embeddings[neg_idx].astype(jnp.float32)
    pos_loss = jnp.sum((a - p + _EPS) ** 2, axis=-1)
    neg_d = jnp.sqrt(jnp.sum((a - n + _EPS) ** 2, axis=-1))
    neg_loss = jnp.maximum(margin - neg_d, 0.0) ** 2
    return jnp.mean(jnp.concatenate([pos_loss, neg_loss]))


if __name__ == "__main__":
    key = jax.random.PRNGKey(0)
    N, D = 8, 128          # small batch, lane-dense hidden dim
    margin = 1.5

    emb = jax.random.normal(key, (N, D), dtype=jnp.float32)
    emb = emb / jnp.linalg.norm(emb, axis=-1, keepdims=True)   # RKD-style L2 norm
    labels = jnp.array([0, 0, 1, 1, 2, 2, 3, 3], dtype=jnp.int32)

    # Mine once (on device) so the kernel and the reference use identical
    # triplets, then run the Pallas loss kernel.
    pos_idx, neg_idx = mine_triplets(emb, labels)
    loss = contrastive_loss_pallas(emb, pos_idx, neg_idx, margin=margin)
    loss = jax.block_until_ready(loss)

    ref = _reference(emb, pos_idx, neg_idx, margin=margin)
    assert np.allclose(np.asarray(loss), np.asarray(ref),
                       rtol=5e-5, atol=1e-5), (loss, ref)
    print("KERNEL_OK")
</pallas_src>

<mosaic_0001>
module attributes {stable_mosaic.version = 11 : i64} {
  func.func @_sampler_loss_kernel(%arg0: i32, %arg1: memref<8x128xf32, #tpu.memory_space<vmem>>, %arg2: memref<8x1xi32, #tpu.memory_space<vmem>>, %arg3: memref<8x1xi32, #tpu.memory_space<vmem>>, %arg4: memref<1x1xf32, #tpu.memory_space<vmem>>) attributes {dimension_semantics = [#tpu.dimension_semantics<arbitrary>], iteration_bounds = array<i64: 1>, scalar_prefetch = 0 : i64, scratch_operands = 0 : i64, tpu.core_type = #tpu.core_type<tc>, window_params = [{pipeline_mode = #tpu.pipeline_mode<synchronous>, transform_indices = @transform_0, window_bounds = array<i64: 8, 128>}, {pipeline_mode = #tpu.pipeline_mode<synchronous>, transform_indices = @transform_1, window_bounds = array<i64: 8, 1>}, {pipeline_mode = #tpu.pipeline_mode<synchronous>, transform_indices = @transform_2, window_bounds = array<i64: 8, 1>}, {pipeline_mode = #tpu.pipeline_mode<synchronous>, transform_indices = @transform_3, window_bounds = array<i64: 1, 1>}]} {
    %c0 = arith.constant 0 : index
    %c0_0 = arith.constant 0 : index
    %0 = vector.load %arg1[%c0, %c0_0] : memref<8x128xf32, #tpu.memory_space<vmem>>, vector<8x128xf32>
    %1 = tpu.iota {dimensions = array<i32: 1>} : vector<8x8xi32>
    %c0_1 = arith.constant 0 : index
    %c0_2 = arith.constant 0 : index
    %2 = vector.load %arg2[%c0_1, %c0_2] : memref<8x1xi32, #tpu.memory_space<vmem>>, vector<8x1xi32>
    %3 = vector.broadcast %2 : vector<8x1xi32> to vector<8x8xi32>
    %4 = arith.cmpi eq, %3, %1 : vector<8x8xi32>
    %5 = arith.extui %4 : vector<8x8xi1> to vector<8x8xi32>
    %6 = arith.sitofp %5 : vector<8x8xi32> to vector<8x8xf32>
    %c0_3 = arith.constant 0 : index
    %c0_4 = arith.constant 0 : index
    %7 = vector.load %arg3[%c0_3, %c0_4] : memref<8x1xi32, #tpu.memory_space<vmem>>, vector<8x1xi32>
    %8 = vector.broadcast %7 : vector<8x1xi32> to vector<8x8xi32>
    %9 = arith.cmpi eq, %8, %1 : vector<8x8xi32>
    %10 = arith.extui %9 : vector<8x8xi1> to vector<8x8xi32>
    %11 = arith.sitofp %10 : vector<8x8xi32> to vector<8x8xf32>
    %cst = arith.constant dense<0.000000e+00> : vector<8x128xf32>
    %12 = tpu.matmul %6, %0, %cst {dimension_numbers = #tpu.dot_dimension_numbers<[1], [0], [0], [1], [0, 0, 1, 1], [], []>, precision = #tpu.contract_precision<fp32>} : vector<8x8xf32>, vector<8x128xf32>, vector<8x128xf32> -> vector<8x128xf32>
    %cst_5 = arith.constant dense<0.000000e+00> : vector<8x128xf32>
    %13 = tpu.matmul %11, %0, %cst_5 {dimension_numbers = #tpu.dot_dimension_numbers<[1], [0], [0], [1], [0, 0, 1, 1], [], []>, precision = #tpu.contract_precision<fp32>} : vector<8x8xf32>, vector<8x128xf32>, vector<8x128xf32> -> vector<8x128xf32>
    %cst_6 = arith.constant 1.000000e+00 : f32
    %14 = vector.broadcast %cst_6 : f32 to vector<128x1xf32>
    %15 = arith.subf %0, %12 : vector<8x128xf32>
    %cst_7 = arith.constant 9.99999997E-7 : f32
    %16 = vector.broadcast %cst_7 : f32 to vector<8x128xf32>
    %17 = arith.addf %15, %16 : vector<8x128xf32>
    %18 = arith.mulf %17, %17 : vector<8x128xf32>
    %cst_8 = arith.constant dense<0.000000e+00> : vector<8x1xf32>
    %19 = tpu.matmul %18, %14, %cst_8 {dimension_numbers = #tpu.dot_dimension_numbers<[1], [0], [0], [1], [0, 0, 1, 1], [], []>, precision = #tpu.contract_precision<fp32>} : vector<8x128xf32>, vector<128x1xf32>, vector<8x1xf32> -> vector<8x1xf32>
    %20 = arith.subf %0, %13 : vector<8x128xf32>
    %cst_9 = arith.constant 9.99999997E-7 : f32
    %21 = vector.broadcast %cst_9 : f32 to vector<8x128xf32>
    %22 = arith.addf %20, %21 : vector<8x128xf32>
    %23 = arith.mulf %22, %22 : vector<8x128xf32>
    %cst_10 = arith.constant dense<0.000000e+00> : vector<8x1xf32>
    %24 = tpu.matmul %23, %14, %cst_10 {dimension_numbers = #tpu.dot_dimension_numbers<[1], [0], [0], [1], [0, 0, 1, 1], [], []>, precision = #tpu.contract_precision<fp32>} : vector<8x128xf32>, vector<128x1xf32>, vector<8x1xf32> -> vector<8x1xf32>
    %25 = math.sqrt %24 : vector<8x1xf32>
    %cst_11 = arith.constant 1.500000e+00 : f32
    %26 = vector.broadcast %cst_11 : f32 to vector<8x1xf32>
    %27 = arith.subf %26, %25 : vector<8x1xf32>
    %cst_12 = arith.constant 0.000000e+00 : f32
    %28 = vector.broadcast %cst_12 : f32 to vector<8x1xf32>
    %29 = arith.maximumf %27, %28 : vector<8x1xf32>
    %30 = arith.mulf %29, %29 : vector<8x1xf32>
    %31 = arith.addf %19, %30 : vector<8x1xf32>
    %cst_13 = arith.constant dense<0.000000e+00> : vector<1xf32>
    %32 = vector.multi_reduction <add>, %31, %cst_13 [0] : vector<8x1xf32> to vector<1xf32>
    %33 = vector.shape_cast %32 : vector<1xf32> to vector<1x1xf32>
    %cst_14 = arith.constant 6.250000e-02 : f32
    %34 = vector.broadcast %cst_14 : f32 to vector<1x1xf32>
    %35 = arith.mulf %33, %34 : vector<1x1xf32>
    %c0_15 = arith.constant 0 : index
    %c0_16 = arith.constant 0 : index
    %36 = vector.load %arg4[%c0_15, %c0_16] : memref<1x1xf32, #tpu.memory_space<vmem>>, vector<1x1xf32>
    tpu.vector_store %arg4[%c0_15, %c0_16], %35 {strides = array<i32>} : memref<1x1xf32, #tpu.memory_space<vmem>>, vector<1x1xf32>,
    return
  }
  func.func @transform_0(%arg0: i32) -> (i32, i32) {
    %c0_i32 = arith.constant 0 : i32
    %c0_i32_0 = arith.constant 0 : i32
    %c0_i32_1 = arith.constant 0 : i32
    return %c0_i32, %c0_i32_0 : i32, i32
  }
  func.func @transform_1(%arg0: i32) -> (i32, i32) {
    %c0_i32 = arith.constant 0 : i32
    %c0_i32_0 = arith.constant 0 : i32
    %c0_i32_1 = arith.constant 0 : i32
    return %c0_i32, %c0_i32_0 : i32, i32
  }
  func.func @transform_2(%arg0: i32) -> (i32, i32) {
    %c0_i32 = arith.constant 0 : i32
    %c0_i32_0 = arith.constant 0 : i32
    %c0_i32_1 = arith.constant 0 : i32
    return %c0_i32, %c0_i32_0 : i32, i32
  }
  func.func @transform_3(%arg0: i32) -> (i32, i32) {
    %c0_i32 = arith.constant 0 : i32
    %c0_i32_0 = arith.constant 0 : i32
    %c0_i32_1 = arith.constant 0 : i32
    return %c0_i32, %c0_i32_0 : i32, i32
  }
}

</mosaic_0001>

<bundles_post_ra>
// kernel: tpu_custom_call.1
= control target key start
LH: loop header
LB: loop body
LE: loop exit
PB: predicated region body
PF: predicated region fallthrough
CT: control target
= control target key end

     0   :  { %v2454_v1 = vmov 0   ;;  %v2455_v2 = vmov 0.0   ;;  %s2706_s0 = inlined_call_operand.vmem [shape: f32[8,128], index: 0, kind: input, shape index: {}]   ;;  %s2707_s1 = inlined_call_operand.vmem [shape: s32[8,1], index: 1, kind: input, shape index: {}]   ;;  %s2708_s2 = inlined_call_operand.vmem [shape: s32[8,1], index: 2, kind: input, shape index: {}]   ;;  %s2709_s3 = inlined_call_operand.hbm [shape: f32[1,1], index: 3, kind: output, shape index: {}]  }
   0x1   :  { %v25_v0 = vld [vmem:[%s2708_s2] sm:$0xff]  ;;  %2427 = vset.pattern.permute.xlu0 %v2454_v1  ;;  %2014 = vmatprep.subr.mxu1 %v2455_v2 }
   0x2   :  { %8 = vsyncpa [#allocation3], 0  ;;  %27 = vperm.xlu0 %2427, %v25_v0   ;;  %1984 = vmatprep.subr.mxu0 %v2455_v2  ;;  %v18_v3 = vld [vmem:[%s2707_s1] sm:$0xff]  ;;  %vm2456_vm0 = vmmov 0   ;;  %v16_v6 = vlaneseq  ;;  %vm32_vm1 = vcmask 64512   ;;  %v2457_v26 = vmov 0.0|0.0  }
   0x3   :  { %v2491_v4 = vld [vmem:[%s2706_s0] sm:$0xff]  ;;  %2016 = vmatprep.mubr.msk.f32.mxu1 %vm2456_vm0, %v2455_v2  ;;  %1986 = vmatprep.mubr.msk.f32.mxu0 %vm2456_vm0, %v2455_v2  ;;  %v2458_v27 = vmov 1.0|1.0   ;;  %vm1813_vm6 = vcmask 7168   ;;  %s2459_s0 = smov [#allocation2]   ;;  %vm1822_vm7 = vcmask 0  }
   0x4   :  { %v2494_v5 = vand.u32 4294901760, %v2491_v4  ;;  %v17_v7 = vand.u32 127, %v16_v6  ;;  %s1830_s1 = sshll.u32 %s2459_s0, 4  ;;  %s1831_s1 = int_to_ptr.vmem [resolvable:$true] %s1830_s1 }
   0x5   :  { %s2430_s2 = scalar_lea.vmem %s1831_s1, 16  ;;  %s2434_s18 = scalar_lea.vmem %s1831_s1, 32 }
   0x6   :  { %20 = vperm.xlu0 %2427, %v18_v3   ;;  %2015 = vmatpush3.msra.mxu1 %v2494_v5  ;;  %v114_v8 = vsub.f32 %v2491_v4, %v2494_v5  ;;  %p2431_p0 = scmp.ne.s32.totalorder %s1831_s1, %s2430_s2  ;;  %p2435_p1 = scmp.lt.s32.totalorder %s1831_s1, %s1831_s1 }
   0x7   :  { %1985 = vmatpush3.msra.mxu0 %v2494_v5  ;;  %2019 = vmatprep.subr.mxu1 %v2455_v2  ;;  %p2436_p2 = scmp.lt.s32.totalorder %s2434_s18, %s2430_s2 }
   0x8   :  { %1989 = vmatprep.subr.mxu0 %v2455_v2  ;;  %v115_v10 = vand.u32 4294901760, %v114_v8 }
   0x9   :  { %p2437_p3 = por %p2436_p2, %p2435_p1 }
   0xa   :  { %v116_v15 = vsub.f32 %v114_v8, %v115_v10 }
   0xb   :  { %p2438_p4 = pnand %p2437_p3, %p2431_p0 }
   0xc   :  { %v117_v21 = vand.u32 4294901760, %v116_v15 }
  0x81   :  { %v28_v9 = vpop.permute.xlu0 %27 }
  0x82   :  { %vm29_vm2 = vcmp.eq.s32.totalorder %v28_v9, %v17_v7 }
  0x83   :  { %v1839_v11 = vsel %vm29_vm2, 1.0, %v2455_v2 }
  0x84   :  { %v483_v12 = vsel %vm32_vm1, %v1839_v11, 0 }
  0x85   :  { %v552_v13 = vsub.f32 %v483_v12, %v483_v12  ;;  %v21_v14 = vpop.permute.xlu0 %20 }
  0x86   :  { %vm22_vm3 = vcmp.eq.s32.totalorder %v21_v14, %v17_v7 }
  0x87   :  { %v1838_v16 = vsel %vm22_vm3, 1.0, %v2455_v2  ;;  %v553_v17 = vand.u32 4294901760, %v552_v13 }
  0x88   :  { %v34_v18 = vsel %vm32_vm1, %v1838_v16, 0 }
  0x89   :  { %v103_v19 = vsub.f32 %v34_v18, %v34_v18  ;;  %v554_v20 = vsub.f32 %v552_v13, %v553_v17 }
  0x8b   :  { %v555_v22 = vand.u32 4294901760, %v554_v20  ;;  %v104_v23 = vand.u32 4294901760, %v103_v19 }
  0x8d   :  { %2017 = vmatmul.mubr.f32.vlgmr.msra.gmra.mrb[0].mxu1 %v555_v22  ;;  %v105_v24 = vsub.f32 %v103_v19, %v104_v23 }
  0x8e   :  { %2020 = vmatpush3.msra.mxu1 %v117_v21  ;;  %2021 = vmatprep.mubr.msk.f32.mxu1 %vm2456_vm0, %v2455_v2 }
  0x8f   :  { %v106_v25 = vand.u32 4294901760, %v105_v24  ;;  %2024 = vmatprep.subr.mxu1 %v2455_v2 }
  0x91   :  { %1987 = vmatmul.mubr.f32.vlgmr.msra.gmra.mrb[0].mxu0 %v106_v25 }
  0x92   :  { %1990 = vmatpush3.msra.mxu0 %v117_v21  ;;  %1991 = vmatprep.mubr.msk.f32.mxu0 %vm2456_vm0, %v2455_v2 }
  0x93   :  { %1994 = vmatprep.subr.mxu0 %v2455_v2 }
  0x95   :  { %2022 = vmatmul.mubr.msk.f32.vlgmr.msra.gmra.mrb[0].mxu1 %vm32_vm1, %v1839_v11 }
  0x96   :  { %2025 = vmatpush3.msra.mxu1 %v114_v8  ;;  %2026 = vmatprep.mubr.msk.f32.mxu1 %vm2456_vm0, %v2455_v2 }
  0x97   :  { %2029 = vmatprep.subr.mxu1 %v2455_v2 }
  0x99   :  { %1992 = vmatmul.mubr.msk.f32.vlgmr.msra.gmra.mrb[0].mxu0 %vm32_vm1, %v1838_v16 }
  0x9a   :  { %1995 = vmatpush3.msra.mxu0 %v114_v8  ;;  %1996 = vmatprep.mubr.msk.f32.mxu0 %vm2456_vm0, %v2455_v2 }
  0x9b   :  { %1999 = vmatprep.subr.mxu0 %v2455_v2 }
  0x9d   :  { %2027 = vmatmul.mubr.f32.vlgmr.msra.gmra.mrb[0].mxu1 %v552_v13 }
  0x9e   :  { %2030 = vmatpush3.msra.mxu1 %v2494_v5  ;;  %2031 = vmatprep.mubr.msk.f32.mxu1 %vm2456_vm0, %v2455_v2 }
  0x9f   :  { %2034 = vmatprep.subr.mxu1 %v2455_v2 }
  0xa1   :  { %1997 = vmatmul.mubr.f32.vlgmr.msra.gmra.mrb[0].mxu0 %v103_v19 }
  0xa2   :  { %2000 = vmatpush3.msra.mxu0 %v2494_v5  ;;  %2001 = vmatprep.mubr.msk.f32.mxu0 %vm2456_vm0, %v2455_v2 }
  0xa3   :  { %2004 = vmatprep.subr.mxu0 %v2455_v2 }
  0xa5   :  { %2032 = vmatmul.mubr.f32.vlgmr.msra.gmra.mrb[0].mxu1 %v553_v17 }
  0xa6   :  { %2035 = vmatpush3.msra.mxu1 %v115_v10  ;;  %2036 = vmatprep.mubr.msk.f32.mxu1 %vm2456_vm0, %v2455_v2 }
  0xa7   :  { %2039 = vmatprep.subr.mxu1 %v2455_v2 }
  0xa9   :  { %2002 = vmatmul.mubr.f32.vlgmr.msra.gmra.mrb[0].mxu0 %v104_v23 }
  0xaa   :  { %2005 = vmatpush3.msra.mxu0 %v115_v10  ;;  %2006 = vmatprep.mubr.msk.f32.mxu0 %vm2456_vm0, %v2455_v2 }
  0xab   :  { %2009 = vmatprep.subr.mxu0 %v2455_v2 }
  0xad   :  { %2037 = vmatmul.mubr.msk.f32.vlgmr.msra.gmra.mrb[0].mxu1 %vm32_vm1, %v1839_v11 }
  0xae   :  { %2040 = vmatpush3.msra.mxu1 %v2494_v5  ;;  %2041 = vmatprep.mubr.msk.f32.mxu1 %vm2456_vm0, %v2455_v2 }
  0xaf   :  { %2332 = vmatprep.subr.bf16.mxu1 %v2457_v26 }
  0xb1   :  { %2007 = vmatmul.mubr.msk.f32.vlgmr.msra.gmra.mrb[0].mxu0 %vm32_vm1, %v1838_v16 }
  0xb2   :  { %2010 = vmatpush3.msra.mxu0 %v2494_v5  ;;  %2011 = vmatprep.mubr.msk.f32.mxu0 %vm2456_vm0, %v2455_v2 }
  0xb3   :  { %2284 = vmatprep.subr.bf16.mxu0 %v2457_v26 }
  0xb5   :  { %2042 = vmatmul.mubr.msk.f32.vlgmr.msra.gmra.mrb[0].mxu1 %vm32_vm1, %v1839_v11 }
  0xb6   :  { %2333 = vmatpush3.bf16.msra.mxu1 %v2458_v27  ;;  %2196 = vmatprep.mubr.msk.f32.mxu1 %vm2456_vm0, %v2455_v2 }
  0xb7   :  { %2334 = vmatprep.subr.bf16.mxu1 %v2457_v26 }
  0xb9   :  { %2012 = vmatmul.mubr.msk.f32.vlgmr.msra.gmra.mrb[0].mxu0 %vm32_vm1, %v1838_v16 }
  0xba   :  { %2285 = vmatpush3.bf16.msra.mxu0 %v2458_v27  ;;  %2335 = vmatpush3.bf16.msra.mxu1 %v2458_v27 }
  0xbb   :  { %2286 = vmatprep.subr.bf16.mxu0 %v2457_v26  ;;  %2336 = vmatprep.subr.bf16.mxu1 %v2457_v26 }
  0xbc   :  { %2076 = vmatprep.mubr.msk.f32.mxu0 %vm2456_vm0, %v2455_v2 }
  0xbe   :  { %2287 = vmatpush3.bf16.msra.mxu0 %v2458_v27  ;;  %2337 = vmatpush3.bf16.msra.mxu1 %v2458_v27 }
  0xbf   :  { %2288 = vmatprep.subr.bf16.mxu0 %v2457_v26  ;;  %2338 = vmatprep.subr.bf16.mxu1 %v2457_v26 }
  0xc2   :  { %2289 = vmatpush3.bf16.msra.mxu0 %v2458_v27  ;;  %2339 = vmatpush3.bf16.msra.mxu1 %v2458_v27 }
  0xc3   :  { %2290 = vmatprep.subr.bf16.mxu0 %v2457_v26  ;;  %2340 = vmatprep.subr.bf16.mxu1 %v2457_v26 }
  0xc6   :  { %2291 = vmatpush3.bf16.msra.mxu0 %v2458_v27  ;;  %2341 = vmatpush3.bf16.msra.mxu1 %v2458_v27 }
  0xc7   :  { %2292 = vmatprep.subr.bf16.mxu0 %v2457_v26  ;;  %2342 = vmatprep.subr.bf16.mxu1 %v2457_v26 }
  0xca   :  { %2293 = vmatpush3.bf16.msra.mxu0 %v2458_v27  ;;  %2343 = vmatpush3.bf16.msra.mxu1 %v2458_v27 }
  0xcb   :  { %2294 = vmatprep.subr.bf16.mxu0 %v2457_v26  ;;  %2344 = vmatprep.subr.bf16.mxu1 %v2457_v26 }
  0xce   :  { %2295 = vmatpush3.bf16.msra.mxu0 %v2458_v27  ;;  %2345 = vmatpush3.bf16.msra.mxu1 %v2458_v27 }
  0xcf   :  { %2296 = vmatprep.subr.bf16.mxu0 %v2457_v26  ;;  %2346 = vmatprep.subr.bf16.mxu1 %v2457_v26 }
  0xd2   :  { %2297 = vmatpush3.bf16.msra.mxu0 %v2458_v27  ;;  %2347 = vmatpush3.bf16.msra.mxu1 %v2458_v27 }
  0xd3   :  { %2298 = vmatprep.subr.bf16.mxu0 %v2457_v26  ;;  %2199 = vmatprep.subr.mxu1 %v2455_v2 }
  0xd6   :  { %2299 = vmatpush3.bf16.msra.mxu0 %v2458_v27 }
  0xd7   :  { %2079 = vmatprep.subr.mxu0 %v2455_v2 }
 0x188   :  { %v927_v28 = vpop.f32.mrb[0].mxu1 }
 0x189   :  { %v934_v29 = vsub.f32 %v2491_v4, %v927_v28  ;;  %v2043_v30 = vpop.f32.mrb[1].mxu1 }
 0x18b   :  { %v935_v31 = vadd.f32 1e-06, %v934_v29 }
 0x18c   :  { %v478_v32 = vpop.f32.mrb[0].mxu0 }
 0x18d   :  { %v936_v33 = vmul.f32 %v935_v31, %v935_v31  ;;  %v931_v34 = vsub.f32 %v2491_v4, %v478_v32  ;;  %v2013_v35 = vpop.f32.mrb[1].mxu0 }
 0x18f   :  { %v2588_v36 = vand.u32 4294901760, %v936_v33  ;;  %v932_v37 = vadd.f32 1e-06, %v931_v34 }
 0x191   :  { %v1003_v38 = vsub.f32 %v936_v33, %v2588_v36  ;;  %v933_v39 = vmul.f32 %v932_v37, %v932_v37 }
 0x193   :  { %v1004_v40 = vand.u32 4294901760, %v1003_v38  ;;  %v2591_v41 = vand.u32 4294901760, %v933_v39 }
 0x195   :  { %v1446_v42 = vsub.f32 %v933_v39, %v2591_v41  ;;  %v1005_v43 = vsub.f32 %v1003_v38, %v1004_v40 }
 0x197   :  { %v1447_v44 = vand.u32 4294901760, %v1446_v42  ;;  %v1006_v45 = vand.u32 4294901760, %v1005_v43 }
 0x199   :  { %2077 = vmatmul.mubr.f32.vlgmr.msra.gmra.mrb[2].mxu0 %v1006_v45  ;;  %v1448_v46 = vsub.f32 %v1446_v42, %v1447_v44 }
 0x19a   :  { %2080 = vmatpush3.msra.mxu0 %v2455_v2  ;;  %2081 = vmatprep.mubr.msk.f32.mxu0 %vm2456_vm0, %v2455_v2 }
 0x19b   :  { %v1449_v47 = vand.u32 4294901760, %v1448_v46  ;;  %2084 = vmatprep.subr.mxu0 %v2455_v2 }
 0x19d   :  { %2197 = vmatmul.mubr.f32.vlgmr.msra.gmra.mrb[2].mxu1 %v1449_v47 }
 0x19e   :  { %2200 = vmatpush3.msra.mxu1 %v2455_v2  ;;  %2201 = vmatprep.mubr.msk.f32.mxu1 %vm2456_vm0, %v2455_v2 }
 0x19f   :  { %2204 = vmatprep.subr.mxu1 %v2455_v2 }
 0x1a1   :  { %2082 = vmatmul.mubr.f32.vlgmr.msra.gmra.mrb[2].mxu0 %v2588_v36 }
 0x1a2   :  { %2085 = vmatpush3.msra.mxu0 %v2455_v2  ;;  %2086 = vmatprep.mubr.msk.f32.mxu0 %vm2456_vm0, %v2455_v2 }
 0x1a3   :  { %2300 = vmatprep.subr.bf16.mxu0 %v2457_v26 }
 0x1a5   :  { %2202 = vmatmul.mubr.f32.vlgmr.msra.gmra.mrb[2].mxu1 %v2591_v41 }
 0x1a6   :  { %2205 = vmatpush3.msra.mxu1 %v2455_v2  ;;  %2206 = vmatprep.mubr.msk.f32.mxu1 %vm2456_vm0, %v2455_v2 }
 0x1a7   :  { %2348 = vmatprep.subr.bf16.mxu1 %v2457_v26 }
 0x1a9   :  { %2087 = vmatmul.mubr.f32.vlgmr.msra.gmra.mrb[2].mxu0 %v1003_v38 }
 0x1aa   :  { %2301 = vmatpush3.bf16.msra.mxu0 %v2458_v27  ;;  %2121 = vmatprep.mubr.msk.f32.mxu0 %vm2456_vm0, %v2455_v2 }
 0x1ab   :  { %2302 = vmatprep.subr.bf16.mxu0 %v2457_v26 }
 0x1ad   :  { %2207 = vmatmul.mubr.f32.vlgmr.msra.gmra.mrb[2].mxu1 %v1446_v42 }
 0x1ae   :  { %2303 = vmatpush3.bf16.msra.mxu0 %v2458_v27  ;;  %2349 = vmatpush3.bf16.msra.mxu1 %v2458_v27 }
 0x1af   :  { %2304 = vmatprep.subr.bf16.mxu0 %v2457_v26  ;;  %2350 = vmatprep.subr.bf16.mxu1 %v2457_v26 }
 0x1b0   :  { %2241 = vmatprep.mubr.msk.f32.mxu1 %vm2456_vm0, %v2455_v2 }
 0x1b2   :  { %2305 = vmatpush3.bf16.msra.mxu0 %v2458_v27  ;;  %2351 = vmatpush3.bf16.msra.mxu1 %v2458_v27 }
 0x1b3   :  { %2306 = vmatprep.subr.bf16.mxu0 %v2457_v26  ;;  %2352 = vmatprep.subr.bf16.mxu1 %v2457_v26 }
 0x1b6   :  { %2307 = vmatpush3.bf16.msra.mxu0 %v2458_v27  ;;  %2353 = vmatpush3.bf16.msra.mxu1 %v2458_v27 }
 0x1b7   :  { %2308 = vmatprep.subr.bf16.mxu0 %v2457_v26  ;;  %2354 = vmatprep.subr.bf16.mxu1 %v2457_v26 }
 0x1ba   :  { %2309 = vmatpush3.bf16.msra.mxu0 %v2458_v27  ;;  %2355 = vmatpush3.bf16.msra.mxu1 %v2458_v27 }
 0x1bb   :  { %2310 = vmatprep.subr.bf16.mxu0 %v2457_v26  ;;  %2356 = vmatprep.subr.bf16.mxu1 %v2457_v26 }
 0x1be   :  { %2311 = vmatpush3.bf16.msra.mxu0 %v2458_v27  ;;  %2357 = vmatpush3.bf16.msra.mxu1 %v2458_v27 }
 0x1bf   :  { %2312 = vmatprep.subr.bf16.mxu0 %v2457_v26  ;;  %2358 = vmatprep.subr.bf16.mxu1 %v2457_v26 }
 0x1c2   :  { %2313 = vmatpush3.bf16.msra.mxu0 %v2458_v27  ;;  %2359 = vmatpush3.bf16.msra.mxu1 %v2458_v27 }
 0x1c3   :  { %2314 = vmatprep.subr.bf16.mxu0 %v2457_v26  ;;  %2360 = vmatprep.subr.bf16.mxu1 %v2457_v26 }
 0x1c6   :  { %2315 = vmatpush3.bf16.msra.mxu0 %v2458_v27  ;;  %2361 = vmatpush3.bf16.msra.mxu1 %v2458_v27 }
 0x1c7   :  { %2124 = vmatprep.subr.mxu0 %v2455_v2  ;;  %2362 = vmatprep.subr.bf16.mxu1 %v2457_v26 }
 0x1c9   :  { %2122 = vmatmul.mubr.f32.vlgmr.msra.gmra.mrb[2].mxu0 %v1004_v40 }
 0x1ca   :  { %2125 = vmatpush3.msra.mxu0 %v2455_v2  ;;  %2363 = vmatpush3.bf16.msra.mxu1 %v2458_v27 }
 0x1cb   :  { %2126 = vmatprep.mubr.msk.f32.mxu0 %vm2456_vm0, %v2455_v2  ;;  %2316 = vmatprep.subr.bf16.mxu0 %v2457_v26 }
 0x1cc   :  { %2244 = vmatprep.subr.mxu1 %v2455_v2 }
 0x1cd   :  { %2242 = vmatmul.mubr.f32.vlgmr.msra.gmra.mrb[2].mxu1 %v1447_v44 }
 0x1ce   :  { %2245 = vmatpush3.msra.mxu1 %v2455_v2  ;;  %2246 = vmatprep.mubr.msk.f32.mxu1 %vm2456_vm0, %v2455_v2 }
 0x1cf   :  { %2364 = vmatprep.subr.bf16.mxu1 %v2457_v26 }
 0x1d1   :  { %2127 = vmatmul.mubr.f32.vlgmr.msra.gmra.mrb[2].mxu0 %v2588_v36 }
 0x1d2   :  { %2317 = vmatpush3.bf16.msra.mxu0 %v2458_v27  ;;  %2161 = vmatprep.mubr.msk.f32.mxu0 %vm2456_vm0, %v2455_v2 }
 0x1d3   :  { %2318 = vmatprep.subr.bf16.mxu0 %v2457_v26 }
 0x1d5   :  { %2247 = vmatmul.mubr.f32.vlgmr.msra.gmra.mrb[2].mxu1 %v2591_v41 }
 0x1d6   :  { %2319 = vmatpush3.bf16.msra.mxu0 %v2458_v27  ;;  %2365 = vmatpush3.bf16.msra.mxu1 %v2458_v27 }
 0x1d7   :  { %2320 = vmatprep.subr.bf16.mxu0 %v2457_v26  ;;  %2366 = vmatprep.subr.bf16.mxu1 %v2457_v26 }
 0x1d8   :  { %2281 = vmatprep.mubr.msk.f32.mxu1 %vm2456_vm0, %v2455_v2 }
 0x1da   :  { %2321 = vmatpush3.bf16.msra.mxu0 %v2458_v27  ;;  %2367 = vmatpush3.bf16.msra.mxu1 %v2458_v27 }
 0x1db   :  { %2322 = vmatprep.subr.bf16.mxu0 %v2457_v26  ;;  %2368 = vmatprep.subr.bf16.mxu1 %v2457_v26 }
 0x1de   :  { %2323 = vmatpush3.bf16.msra.mxu0 %v2458_v27  ;;  %2369 = vmatpush3.bf16.msra.mxu1 %v2458_v27 }
 0x1df   :  { %2324 = vmatprep.subr.bf16.mxu0 %v2457_v26  ;;  %2370 = vmatprep.subr.bf16.mxu1 %v2457_v26 }
 0x1e2   :  { %2325 = vmatpush3.bf16.msra.mxu0 %v2458_v27  ;;  %2371 = vmatpush3.bf16.msra.mxu1 %v2458_v27 }
 0x1e3   :  { %2326 = vmatprep.subr.bf16.mxu0 %v2457_v26  ;;  %2372 = vmatprep.subr.bf16.mxu1 %v2457_v26 }
 0x1e6   :  { %2327 = vmatpush3.bf16.msra.mxu0 %v2458_v27  ;;  %2373 = vmatpush3.bf16.msra.mxu1 %v2458_v27 }
 0x1e7   :  { %2328 = vmatprep.subr.bf16.mxu0 %v2457_v26  ;;  %2374 = vmatprep.subr.bf16.mxu1 %v2457_v26 }
 0x1ea   :  { %2329 = vmatpush3.bf16.msra.mxu0 %v2458_v27  ;;  %2375 = vmatpush3.bf16.msra.mxu1 %v2458_v27 }
 0x1eb   :  { %2330 = vmatprep.subr.bf16.mxu0 %v2457_v26  ;;  %2376 = vmatprep.subr.bf16.mxu1 %v2457_v26 }
 0x1ee   :  { %2331 = vmatpush3.bf16.msra.mxu0 %v2458_v27  ;;  %2377 = vmatpush3.bf16.msra.mxu1 %v2458_v27 }
 0x1ef   :  { %2378 = vmatprep.subr.bf16.mxu1 %v2457_v26 }
 0x1f1   :  { %2162 = vmatmul.mubr.f32.vlgmr.msra.gmra.mrb[2].mxu0 %v2588_v36 }
 0x1f2   :  { %2379 = vmatpush3.bf16.msra.mxu1 %v2458_v27 }
 0x1f5   :  { %2282 = vmatmul.mubr.f32.vlgmr.msra.gmra.mrb[2].mxu1 %v2591_v41 }
 0x2c4   :  { %v1366_v48 = vpop.f32.mrb[2].mxu0 }
 0x2c5   :  { %2428 = vrsqrt.f32 %v1366_v48  ;;  %v2163_v49 = vpop.f32.mrb[3].mxu0  ;;  %vm1372_vm4 = vcmp.eq.f32.partialorder %v1366_v48, inf  ;;  %v1375_v54 = vand.u32 2147483648, %v1366_v48  ;;  %vm1374_vm5 = vcmp.eq.f32.partialorder %v1366_v48, 0.0 }
 0x2c8   :  { %v1809_v50 = vpop.f32.mrb[2].mxu1 }
 0x2c9   :  { %v2283_v51 = vpop.f32.mrb[3].mxu1 }
 0x2cf   :  { %v2429_v52 = vpop.eup %2428 }
 0x2d0   :  { %v1371_v53 = vmul.f32 %v2429_v52, %v1366_v48 }
 0x2d2   :  { %v1373_v55 = vsel %vm1372_vm4, %v1366_v48, %v1371_v53 }
 0x2d3   :  { %v1376_v56 = vsel %vm1374_vm5, %v1375_v54, %v1373_v55 }
 0x2d4   :  { %v1377_v57 = vsub.f32 1.5, %v1376_v56 }
 0x2d6   :  { %v1378_v58 = vmax.f32 %v1377_v57, 0.0 }
 0x2d8   :  { %v1379_v59 = vmul.f32 %v1378_v58, %v1378_v58 }
 0x2da   :  { %v2380_v60 = vadd.f32 %v1809_v50, %v1379_v59 }
 0x2dc   :  { %v1814_v61 = vsel %vm1813_vm6, %v2380_v60, 0.0 }
 0x2dd   :  { %v1815_v62 = vrot.slane %v1814_v61, 4 }
 0x2df   :  { %v1816_v63 = vadd.f32 %v1815_v62, %v1814_v61 }
 0x2e1   :  { %v1817_v0 = vrot.slane %v1816_v63, 2 }
 0x2e3   :  { %v1818_v1 = vadd.f32 %v1817_v0, %v1816_v63 }
 0x2e5   :  { %v1819_v2 = vrot.slane %v1818_v1, 1 }
 0x2e7   :  { %v1820_v3 = vadd.f32 %v1819_v2, %v1818_v1 }
 0x2e9   :  { %v1821_v4 = vmul.f32 0.0625, %v1820_v3 }
 0x2eb   :  { %1823 = vst.msk [vmem:[#allocation2] sm:$0x1] %vm1822_vm7, %v1821_v4 }
 0x2ec   :  { %2441 = shalt.err (!%p2438_p4)
}
 0x2ed   :  { %s2442_s21 = scalar_lea.hbm %s2709_s3, 16 }
 0x2ee   :  { %p2443_p5 = scmp.ne.s32.totalorder %s2709_s3, %s2442_s21  ;;  %p2446_p6 = scmp.lt.u32.totalorder %s2442_s21, %s2709_s3 }
 0x2f0   :  { %p2448_p7 = pnand %p2446_p6, %p2443_p5 }
 0x2f2   :  { %2451 = shalt.err (!%p2448_p7)
}
 0x2f3   :  { %1833 = dma.vmem_to_hbm [thread:$0]  %s1831_s1, 16, %s2709_s3, [#allocation3]  }
 0x2f4   :  { %2452 = dma.done.wait [#allocation3], 16  }
 0x2f5   :  { %2453 = vsyncadd [#allocation3], 4294967280 }
 0x2f6   :  { %1837 = vsyncpa [#allocation3], 1 }

</bundles_post_ra>
